<compile_context>
chip_gen: v7x
topology: tpu7x:2x2x1
jax: 0.10.0
libtpu: 0.0.40
codegen_flags: <defaults>
</compile_context>

<pallas_src>
import functools

import jax
import jax.numpy as jnp
from jax.experimental import pallas as pl
from jax.experimental.pallas import tpu as pltpu

_LANE = 128
_SUBLANE = 8


def _round_up(n, m):
    return ((n + m - 1) // m) * m


def _ae_kernel(x_ref, w1_ref, b1_ref, w2_ref, b2_ref,
               w3_ref, b3_ref, w4_ref, b4_ref,
               enc_ref, dec_ref):
    # x tile: (TILE_B, 896) bf16; weights bf16; biases f32.
    x = x_ref[...]

    # encoder: Linear(784, 256) + ReLU  (f32 accumulation on the MXU)
    h1 = jnp.dot(x, w1_ref[...], preferred_element_type=jnp.float32) + b1_ref[...]
    h1 = jnp.maximum(h1, 0.0).astype(jnp.bfloat16)

    # encoder: Linear(256, hidden) + ReLU
    enc = jnp.dot(h1, w2_ref[...], preferred_element_type=jnp.float32) + b2_ref[...]
    enc = jnp.maximum(enc, 0.0)
    enc_ref[...] = enc.astype(enc_ref.dtype)

    # decoder: Linear(hidden, 256) + ReLU
    h3 = jnp.dot(enc.astype(jnp.bfloat16), w3_ref[...],
                 preferred_element_type=jnp.float32) + b3_ref[...]
    h3 = jnp.maximum(h3, 0.0).astype(jnp.bfloat16)

    # decoder: Linear(256, 784) + Sigmoid (exact tanh form -> EUP slot)
    logits = jnp.dot(h3, w4_ref[...], preferred_element_type=jnp.float32) + b4_ref[...]
    dec = 0.5 * (jnp.tanh(0.5 * logits) + 1.0)
    dec_ref[...] = dec.astype(dec_ref.dtype)


@functools.partial(jax.jit, static_argnames=("tile_b",))
def autoencoder_forward(x, params, *, tile_b=None):
    """x: (B, C, H, W) or (B, H, W) float32; returns (encoded, decoded)."""
    w1, b1, w2, b2, w3, b3, w4, b4 = params
    B = x.shape[0]
    hidden = w2.shape[1]
    x_flat = x.reshape(B, 784).astype(jnp.float32)             # x.view(-1, 784)

    IN_P = _round_up(784, _LANE)        # 896 = 7*128 -> lane-dense loads/stores
    HID_P = _round_up(hidden, _LANE)    # >=128 -> unmasked encoded stores

    # Batch tile: 256-row multiples for large batches (fills v6e/v7x MXU, fits
    # v7x scoped VMEM with double buffering); tiny batches round up to 8 rows.
    if tile_b is None:
        tile_b = 256 if B >= 256 else max(_SUBLANE, _round_up(B, _SUBLANE))
    BP = _round_up(B, tile_b)

    # ---- pad + cast (glue, plain JAX; fused under jit) ---------------------
    xp = jnp.zeros((BP, IN_P), jnp.float32).at[:B, :784].set(x_flat)
    xp = xp.astype(jnp.bfloat16)
    w1p = jnp.zeros((IN_P, 256), jnp.float32).at[:784, :].set(w1).astype(jnp.bfloat16)
    b1p = b1.reshape(1, 256).astype(jnp.float32)
    w2p = jnp.zeros((256, HID_P), jnp.float32).at[:, :hidden].set(w2).astype(jnp.bfloat16)
    b2p = jnp.zeros((1, HID_P), jnp.float32).at[:, :hidden].set(b2.reshape(1, hidden))
    w3p = jnp.zeros((HID_P, 256), jnp.float32).at[:hidden, :].set(w3).astype(jnp.bfloat16)
    b3p = b3.reshape(1, 256).astype(jnp.float32)
    w4p = jnp.zeros((256, IN_P), jnp.float32).at[:, :784].set(w4).astype(jnp.bfloat16)
    b4p = jnp.zeros((1, IN_P), jnp.float32).at[:, :784].set(b4.reshape(1, 784))

    grid = (BP // tile_b,)
    batch_map = lambda i: (i, 0)
    const_map = lambda i: (0, 0)

    flops = 2 * B * (784 * 256 + 256 * hidden + hidden * 256 + 256 * 784)
    bytes_accessed = (
        xp.size * 2                                              # bf16 input
        + (w1p.size + w2p.size + w3p.size + w4p.size) * 2        # bf16 weights
        + (b1p.size + b2p.size + b3p.size + b4p.size) * 4        # f32 biases
        + BP * HID_P * 4 + BP * IN_P * 4)                        # f32 outputs
    cost = pl.CostEstimate(flops=flops, transcendentals=B * 784,
                           bytes_accessed=bytes_accessed)

    enc_p, dec_p = pl.pallas_call(
        _ae_kernel,
        out_shape=(
            jax.ShapeDtypeStruct((BP, HID_P), jnp.float32),
            jax.ShapeDtypeStruct((BP, IN_P), jnp.float32),
        ),
        grid=grid,
        in_specs=[
            pl.BlockSpec((tile_b, IN_P), batch_map),   # x tile
            pl.BlockSpec((IN_P, 256), const_map),      # w1 (VMEM-resident)
            pl.BlockSpec((1, 256), const_map),         # b1
            pl.BlockSpec((256, HID_P), const_map),     # w2
            pl.BlockSpec((1, HID_P), const_map),       # b2
            pl.BlockSpec((HID_P, 256), const_map),     # w3
            pl.BlockSpec((1, 256), const_map),         # b3
            pl.BlockSpec((256, IN_P), const_map),      # w4
            pl.BlockSpec((1, IN_P), const_map),        # b4
        ],
        out_specs=(
            pl.BlockSpec((tile_b, HID_P), batch_map),  # encoded tile
            pl.BlockSpec((tile_b, IN_P), batch_map),   # decoded tile
        ),
        compiler_params=pltpu.CompilerParams(
            dimension_semantics=("parallel",),
        ),
        cost_estimate=cost,
    )(xp, w1p, b1p, w2p, b2p, w3p, b3p, w4p, b4p)

    encoded = enc_p[:B, :hidden]
    decoded = dec_p[:B, :784].reshape(-1, 28, 28)      # decoded.view(-1, 28, 28)
    return encoded, decoded


def init_params(hidden, key):
    """Deterministic synthetic weights, torch-Linear-like uniform init."""
    ks = jax.random.split(key, 8)

    def lin(kw, kb, fan_in, fan_out):
        bound = 1.0 / jnp.sqrt(fan_in)
        w = jax.random.uniform(kw, (fan_in, fan_out), jnp.float32, -bound, bound)
        b = jax.random.uniform(kb, (1, fan_out), jnp.float32, -bound, bound)
        return w, b

    w1, b1 = lin(ks[0], ks[1], 784, 256)
    w2, b2 = lin(ks[2], ks[3], 256, hidden)
    w3, b3 = lin(ks[4], ks[5], hidden, 256)
    w4, b4 = lin(ks[6], ks[7], 256, 784)
    return (w1, b1, w2, b2, w3, b3, w4, b4)


def _reference_forward(x, params):
    """Pure-JAX f32 reference (matches the PyTorch module)."""
    w1, b1, w2, b2, w3, b3, w4, b4 = params
    xf = x.reshape(x.shape[0], 784).astype(jnp.float32)
    h1 = jnp.maximum(xf @ w1 + b1, 0.0)
    enc = jnp.maximum(h1 @ w2 + b2, 0.0)
    h3 = jnp.maximum(enc @ w3 + b3, 0.0)
    dec = jax.nn.sigmoid(h3 @ w4 + b4)
    return enc, dec.reshape(-1, 28, 28)


if __name__ == "__main__":
    key = jax.random.PRNGKey(0)
    k_x, k_p = jax.random.split(key)

    B, hidden = 8, 32
    x = jax.random.uniform(k_x, (B, 1, 28, 28), jnp.float32)   # NCHW input
    params = init_params(hidden, k_p)

    encoded, decoded = autoencoder_forward(x, params)
    jax.block_until_ready((encoded, decoded))

    assert encoded.shape == (B, hidden)
    assert decoded.shape == (B, 28, 28)

    # bf16-tolerant correctness check against the f32 reference.
    enc_ref, dec_ref = _reference_forward(x, params)
    assert jnp.all(jnp.isfinite(encoded)) and jnp.all(jnp.isfinite(decoded))
    assert jnp.max(jnp.abs(encoded - enc_ref)) < 5e-2
    assert jnp.max(jnp.abs(decoded - dec_ref)) < 5e-2

    print("KERNEL_OK")
</pallas_src>

<mosaic_0001>
module attributes {stable_mosaic.version = 11 : i64} {
  func.func @_ae_kernel(%arg0: i32, %arg1: memref<8x896xbf16, #tpu.memory_space<vmem>>, %arg2: memref<896x256xbf16, #tpu.memory_space<vmem>>, %arg3: memref<1x256xf32, #tpu.memory_space<vmem>>, %arg4: memref<256x128xbf16, #tpu.memory_space<vmem>>, %arg5: memref<1x128xf32, #tpu.memory_space<vmem>>, %arg6: memref<128x256xbf16, #tpu.memory_space<vmem>>, %arg7: memref<1x256xf32, #tpu.memory_space<vmem>>, %arg8: memref<256x896xbf16, #tpu.memory_space<vmem>>, %arg9: memref<1x896xf32, #tpu.memory_space<vmem>>, %arg10: memref<8x128xf32, #tpu.memory_space<vmem>>, %arg11: memref<8x896xf32, #tpu.memory_space<vmem>>) attributes {dimension_semantics = [#tpu.dimension_semantics<parallel>], iteration_bounds = array<i64: 1>, scalar_prefetch = 0 : i64, scratch_operands = 0 : i64, tpu.core_type = #tpu.core_type<tc>, window_params = [{transform_indices = @transform_0, window_bounds = array<i64: 8, 896>}, {pipeline_mode = #tpu.pipeline_mode<synchronous>, transform_indices = @transform_1, window_bounds = array<i64: 896, 256>}, {pipeline_mode = #tpu.pipeline_mode<synchronous>, transform_indices = @transform_2, window_bounds = array<i64: 1, 256>}, {pipeline_mode = #tpu.pipeline_mode<synchronous>, transform_indices = @transform_3, window_bounds = array<i64: 256, 128>}, {pipeline_mode = #tpu.pipeline_mode<synchronous>, transform_indices = @transform_4, window_bounds = array<i64: 1, 128>}, {pipeline_mode = #tpu.pipeline_mode<synchronous>, transform_indices = @transform_5, window_bounds = array<i64: 128, 256>}, {pipeline_mode = #tpu.pipeline_mode<synchronous>, transform_indices = @transform_6, window_bounds = array<i64: 1, 256>}, {pipeline_mode = #tpu.pipeline_mode<synchronous>, transform_indices = @transform_7, window_bounds = array<i64: 256, 896>}, {pipeline_mode = #tpu.pipeline_mode<synchronous>, transform_indices = @transform_8, window_bounds = array<i64: 1, 896>}, {transform_indices = @transform_9, window_bounds = array<i64: 8, 128>}, {transform_indices = @transform_10, window_bounds = array<i64: 8, 896>}]} {
    %c0 = arith.constant 0 : index
    %c0_0 = arith.constant 0 : index
    %0 = vector.load %arg1[%c0, %c0_0] : memref<8x896xbf16, #tpu.memory_space<vmem>>, vector<8x896xbf16>
    %c0_1 = arith.constant 0 : index
    %c0_2 = arith.constant 0 : index
    %1 = vector.load %arg2[%c0_1, %c0_2] : memref<896x256xbf16, #tpu.memory_space<vmem>>, vector<896x256xbf16>
    %cst = arith.constant dense<0.000000e+00> : vector<8x256xf32>
    %2 = tpu.matmul %0, %1, %cst {dimension_numbers = #tpu.dot_dimension_numbers<[1], [0], [0], [1], [0, 0, 1, 1], [], []>} : vector<8x896xbf16>, vector<896x256xbf16>, vector<8x256xf32> -> vector<8x256xf32>
    %c0_3 = arith.constant 0 : index
    %c0_4 = arith.constant 0 : index
    %3 = vector.load %arg3[%c0_3, %c0_4] : memref<1x256xf32, #tpu.memory_space<vmem>>, vector<1x256xf32>
    %4 = vector.broadcast %3 : vector<1x256xf32> to vector<8x256xf32>
    %5 = arith.addf %2, %4 : vector<8x256xf32>
    %cst_5 = arith.constant 0.000000e+00 : f32
    %6 = vector.broadcast %cst_5 : f32 to vector<8x256xf32>
    %7 = arith.maximumf %5, %6 : vector<8x256xf32>
    %8 = arith.truncf %7 : vector<8x256xf32> to vector<8x256xbf16>
    %c0_6 = arith.constant 0 : index
    %c0_7 = arith.constant 0 : index
    %9 = vector.load %arg4[%c0_6, %c0_7] : memref<256x128xbf16, #tpu.memory_space<vmem>>, vector<256x128xbf16>
    %cst_8 = arith.constant dense<0.000000e+00> : vector<8x128xf32>
    %10 = tpu.matmul %8, %9, %cst_8 {dimension_numbers = #tpu.dot_dimension_numbers<[1], [0], [0], [1], [0, 0, 1, 1], [], []>} : vector<8x256xbf16>, vector<256x128xbf16>, vector<8x128xf32> -> vector<8x128xf32>
    %c0_9 = arith.constant 0 : index
    %c0_10 = arith.constant 0 : index
    %11 = vector.load %arg5[%c0_9, %c0_10] : memref<1x128xf32, #tpu.memory_space<vmem>>, vector<1x128xf32>
    %12 = vector.broadcast %11 : vector<1x128xf32> to vector<8x128xf32>
    %13 = arith.addf %10, %12 : vector<8x128xf32>
    %cst_11 = arith.constant 0.000000e+00 : f32
    %14 = vector.broadcast %cst_11 : f32 to vector<8x128xf32>
    %15 = arith.maximumf %13, %14 : vector<8x128xf32>
    %c0_12 = arith.constant 0 : index
    %c0_13 = arith.constant 0 : index
    %16 = vector.load %arg10[%c0_12, %c0_13] : memref<8x128xf32, #tpu.memory_space<vmem>>, vector<8x128xf32>
    tpu.vector_store %arg10[%c0_12, %c0_13], %15 {strides = array<i32>} : memref<8x128xf32, #tpu.memory_space<vmem>>, vector<8x128xf32>,
    %17 = arith.truncf %15 : vector<8x128xf32> to vector<8x128xbf16>
    %c0_14 = arith.constant 0 : index
    %c0_15 = arith.constant 0 : index
    %18 = vector.load %arg6[%c0_14, %c0_15] : memref<128x256xbf16, #tpu.memory_space<vmem>>, vector<128x256xbf16>
    %cst_16 = arith.constant dense<0.000000e+00> : vector<8x256xf32>
    %19 = tpu.matmul %17, %18, %cst_16 {dimension_numbers = #tpu.dot_dimension_numbers<[1], [0], [0], [1], [0, 0, 1, 1], [], []>} : vector<8x128xbf16>, vector<128x256xbf16>, vector<8x256xf32> -> vector<8x256xf32>
    %c0_17 = arith.constant 0 : index
    %c0_18 = arith.constant 0 : index
    %20 = vector.load %arg7[%c0_17, %c0_18] : memref<1x256xf32, #tpu.memory_space<vmem>>, vector<1x256xf32>
    %21 = vector.broadcast %20 : vector<1x256xf32> to vector<8x256xf32>
    %22 = arith.addf %19, %21 : vector<8x256xf32>
    %cst_19 = arith.constant 0.000000e+00 : f32
    %23 = vector.broadcast %cst_19 : f32 to vector<8x256xf32>
    %24 = arith.maximumf %22, %23 : vector<8x256xf32>
    %25 = arith.truncf %24 : vector<8x256xf32> to vector<8x256xbf16>
    %c0_20 = arith.constant 0 : index
    %c0_21 = arith.constant 0 : index
    %26 = vector.load %arg8[%c0_20, %c0_21] : memref<256x896xbf16, #tpu.memory_space<vmem>>, vector<256x896xbf16>
    %cst_22 = arith.constant dense<0.000000e+00> : vector<8x896xf32>
    %27 = tpu.matmul %25, %26, %cst_22 {dimension_numbers = #tpu.dot_dimension_numbers<[1], [0], [0], [1], [0, 0, 1, 1], [], []>} : vector<8x256xbf16>, vector<256x896xbf16>, vector<8x896xf32> -> vector<8x896xf32>
    %c0_23 = arith.constant 0 : index
    %c0_24 = arith.constant 0 : index
    %28 = vector.load %arg9[%c0_23, %c0_24] : memref<1x896xf32, #tpu.memory_space<vmem>>, vector<1x896xf32>
    %29 = vector.broadcast %28 : vector<1x896xf32> to vector<8x896xf32>
    %30 = arith.addf %27, %29 : vector<8x896xf32>
    %cst_25 = arith.constant 5.000000e-01 : f32
    %31 = vector.broadcast %cst_25 : f32 to vector<8x896xf32>
    %32 = arith.mulf %31, %30 : vector<8x896xf32>
    %33 = math.tanh %32 : vector<8x896xf32>
    %cst_26 = arith.constant 1.000000e+00 : f32
    %34 = vector.broadcast %cst_26 : f32 to vector<8x896xf32>
    %35 = arith.addf %33, %34 : vector<8x896xf32>
    %cst_27 = arith.constant 5.000000e-01 : f32
    %36 = vector.broadcast %cst_27 : f32 to vector<8x896xf32>
    %37 = arith.mulf %36, %35 : vector<8x896xf32>
    %c0_28 = arith.constant 0 : index
    %c0_29 = arith.constant 0 : index
    %38 = vector.load %arg11[%c0_28, %c0_29] : memref<8x896xf32, #tpu.memory_space<vmem>>, vector<8x896xf32>
    tpu.vector_store %arg11[%c0_28, %c0_29], %37 {strides = array<i32>} : memref<8x896xf32, #tpu.memory_space<vmem>>, vector<8x896xf32>,
    return
  }
  func.func @transform_0(%arg0: i32) -> (i32, i32) {
    %c0_i32 = arith.constant 0 : i32
    %c0_i32_0 = arith.constant 0 : i32
    return %arg0, %c0_i32 : i32, i32
  }
  func.func @transform_1(%arg0: i32) -> (i32, i32) {
    %c0_i32 = arith.constant 0 : i32
    %c0_i32_0 = arith.constant 0 : i32
    %c0_i32_1 = arith.constant 0 : i32
    return %c0_i32, %c0_i32_0 : i32, i32
  }
  func.func @transform_2(%arg0: i32) -> (i32, i32) {
    %c0_i32 = arith.constant 0 : i32
    %c0_i32_0 = arith.constant 0 : i32
    %c0_i32_1 = arith.constant 0 : i32
    return %c0_i32, %c0_i32_0 : i32, i32
  }
  func.func @transform_3(%arg0: i32) -> (i32, i32) {
    %c0_i32 = arith.constant 0 : i32
    %c0_i32_0 = arith.constant 0 : i32
    %c0_i32_1 = arith.constant 0 : i32
    return %c0_i32, %c0_i32_0 : i32, i32
  }
  func.func @transform_4(%arg0: i32) -> (i32, i32) {
    %c0_i32 = arith.constant 0 : i32
    %c0_i32_0 = arith.constant 0 : i32
    %c0_i32_1 = arith.constant 0 : i32
    return %c0_i32, %c0_i32_0 : i32, i32
  }
  func.func @transform_5(%arg0: i32) -> (i32, i32) {
    %c0_i32 = arith.constant 0 : i32
    %c0_i32_0 = arith.constant 0 : i32
    %c0_i32_1 = arith.constant 0 : i32
    return %c0_i32, %c0_i32_0 : i32, i32
  }
  func.func @transform_6(%arg0: i32) -> (i32, i32) {
    %c0_i32 = arith.constant 0 : i32
    %c0_i32_0 = arith.constant 0 : i32
    %c0_i32_1 = arith.constant 0 : i32
    return %c0_i32, %c0_i32_0 : i32, i32
  }
  func.func @transform_7(%arg0: i32) -> (i32, i32) {
    %c0_i32 = arith.constant 0 : i32
    %c0_i32_0 = arith.constant 0 : i32
    %c0_i32_1 = arith.constant 0 : i32
    return %c0_i32, %c0_i32_0 : i32, i32
  }
  func.func @transform_8(%arg0: i32) -> (i32, i32) {
    %c0_i32 = arith.constant 0 : i32
    %c0_i32_0 = arith.constant 0 : i32
    %c0_i32_1 = arith.constant 0 : i32
    return %c0_i32, %c0_i32_0 : i32, i32
  }
  func.func @transform_9(%arg0: i32) -> (i32, i32) {
    %c0_i32 = arith.constant 0 : i32
    %c0_i32_0 = arith.constant 0 : i32
    return %arg0, %c0_i32 : i32, i32
  }
  func.func @transform_10(%arg0: i32) -> (i32, i32) {
    %c0_i32 = arith.constant 0 : i32
    %c0_i32_0 = arith.constant 0 : i32
    return %arg0, %c0_i32 : i32, i32
  }
}

</mosaic_0001>

<bundles_post_ra>
// kernel: autoencoder_forward.1
= control target key start
LH: loop header
LB: loop body
LE: loop exit
PB: predicated region body
PF: predicated region fallthrough
CT: control target
= control target key end

     0   :  { %s3876_s0 = inlined_call_operand.vmem [shape: bf16[8,896], index: 0, kind: input, shape index: {}]   ;;  %s3877_s1 = inlined_call_operand.vmem [shape: bf16[896,256], index: 1, kind: input, shape index: {}]   ;;  %s3878_s2 = inlined_call_operand.vmem [shape: f32[1,256], index: 2, kind: input, shape index: {}]   ;;  %s3879_s3 = inlined_call_operand.vmem [shape: bf16[256,128], index: 3, kind: input, shape index: {}]   ;;  %s3880_s4 = inlined_call_operand.vmem [shape: f32[1,128], index: 4, kind: input, shape index: {}]   ;;  %s3881_s5 = inlined_call_operand.vmem [shape: bf16[128,256], index: 5, kind: input, shape index: {}]   ;;  %s3882_s6 = inlined_call_operand.vmem [shape: f32[1,256], index: 6, kind: input, shape index: {}]   ;;  %s3883_s7 = inlined_call_operand.vmem [shape: bf16[256,896], index: 7, kind: input, shape index: {}]   ;;  %s3884_s8 = inlined_call_operand.vmem [shape: f32[1,896], index: 8, kind: input, shape index: {}]   ;;  %s3885_s9 = inlined_call_operand.hbm [shape: f32[8,128], index: 9, kind: output, shape index: {0}]   ;;  %s3886_s10 = inlined_call_operand.vmem [shape: f32[8,896], index: 10, kind: output, shape index: {1}]  }
   0x1   :  { %v2529_v0 = vld [vmem:[%s3877_s1 + $0x4] ss:$8 sps:$4 sm:$0xff]   ;;  %v2531_v1 = vld [vmem:[%s3877_s1] ss:$8 sps:$4 sm:$0xff]   ;;  %v2532_v2 = vld [vmem:[%s3877_s1 + $0x14] ss:$8 sps:$4 sm:$0xff]  }
   0x2   :  { %749 = vmatprep.subr.bf16.mxu0 %v2529_v0  ;;  %v2534_v3 = vld [vmem:[%s3877_s1 + $0x10] ss:$8 sps:$4 sm:$0xff]   ;;  %v2535_v4 = vld [vmem:[%s3877_s1 + $0x24] ss:$8 sps:$4 sm:$0xff]   ;;  %v2537_v5 = vld [vmem:[%s3877_s1 + $0x20] ss:$8 sps:$4 sm:$0xff]  }
   0x3   :  { %750 = vmatpush1.bf16.msra.mxu0 %v2531_v1  ;;  %v2538_v6 = vld [vmem:[%s3877_s1 + $0x34] ss:$8 sps:$4 sm:$0xff]   ;;  %v2540_v7 = vld [vmem:[%s3877_s1 + $0x30] ss:$8 sps:$4 sm:$0xff]   ;;  %v2541_v8 = vld [vmem:[%s3877_s1 + $0x44] ss:$8 sps:$4 sm:$0xff]  }
   0x4   :  { %751 = vmatprep.subr.bf16.mxu0 %v2532_v2  ;;  %v2543_v9 = vld [vmem:[%s3877_s1 + $0x40] ss:$8 sps:$4 sm:$0xff]   ;;  %v2544_v10 = vld [vmem:[%s3877_s1 + $0x54] ss:$8 sps:$4 sm:$0xff]   ;;  %v2546_v11 = vld [vmem:[%s3877_s1 + $0x50] ss:$8 sps:$4 sm:$0xff]  }
   0x5   :  { %v2547_v12 = vld [vmem:[%s3877_s1 + $0x64] ss:$8 sps:$4 sm:$0xff]   ;;  %v2549_v15 = vld [vmem:[%s3877_s1 + $0x60] ss:$8 sps:$4 sm:$0xff]   ;;  %v2550_v16 = vld [vmem:[%s3877_s1 + $0x74] ss:$8 sps:$4 sm:$0xff]  }
   0x6   :  { %v36_v13 = vld [vmem:[%s3876_s0] sm:$0xff]  ;;  %v2552_v17 = vld [vmem:[%s3877_s1 + $0x70] ss:$8 sps:$4 sm:$0xff]   ;;  %v2556_v20 = vld [vmem:[%s3877_s1 + $0x94] ss:$8 sps:$4 sm:$0xff]  }
   0x7   :  { %752 = vmatpush1.bf16.msra.mxu0 %v2534_v3  ;;  %v2206_v14 = vcombine.high %v36_v13, %v36_v13  ;;  %v2553_v18 = vld [vmem:[%s3877_s1 + $0x84] ss:$8 sps:$4 sm:$0xff]   ;;  %v2555_v19 = vld [vmem:[%s3877_s1 + $0x80] ss:$8 sps:$4 sm:$0xff]   ;;  %v2558_v21 = vld [vmem:[%s3877_s1 + $0x90] ss:$8 sps:$4 sm:$0xff]   ;;  %v2205_v36 = vcombine.low %v36_v13, %v36_v13 }
   0x8   :  { %753 = vmatprep.subr.bf16.mxu0 %v2535_v4  ;;  %v2559_v22 = vld [vmem:[%s3877_s1 + $0xa4] ss:$8 sps:$4 sm:$0xff]   ;;  %v2561_v23 = vld [vmem:[%s3877_s1 + $0xa0] ss:$8 sps:$4 sm:$0xff]   ;;  %v2562_v24 = vld [vmem:[%s3877_s1 + $0xb4] ss:$8 sps:$4 sm:$0xff]  }
   0x9   :  { %781 = vmatprep.mubr.bf16.mxu0 %v2206_v14  ;;  %v2564_v25 = vld [vmem:[%s3877_s1 + $0xb0] ss:$8 sps:$4 sm:$0xff]   ;;  %v2565_v26 = vld [vmem:[%s3877_s1 + $0xc4] ss:$8 sps:$4 sm:$0xff]   ;;  %v2567_v27 = vld [vmem:[%s3877_s1 + $0xc0] ss:$8 sps:$4 sm:$0xff]  }
   0xa   :  { %v2568_v28 = vld [vmem:[%s3877_s1 + $0xd4] ss:$8 sps:$4 sm:$0xff]   ;;  %v2570_v29 = vld [vmem:[%s3877_s1 + $0xd0] ss:$8 sps:$4 sm:$0xff]   ;;  %v2571_v30 = vld [vmem:[%s3877_s1 + $0xe4] ss:$8 sps:$4 sm:$0xff]  }
   0xb   :  { %754 = vmatpush1.bf16.msra.mxu0 %v2537_v5  ;;  %v2573_v31 = vld [vmem:[%s3877_s1 + $0xe0] ss:$8 sps:$4 sm:$0xff]   ;;  %v2574_v32 = vld [vmem:[%s3877_s1 + $0xf4] ss:$8 sps:$4 sm:$0xff]   ;;  %v2576_v33 = vld [vmem:[%s3877_s1 + $0xf0] ss:$8 sps:$4 sm:$0xff]  }
   0xc   :  { %755 = vmatprep.subr.bf16.mxu0 %v2538_v6  ;;  %v2581_v34 = vld [vmem:[%s3877_s1 + $0x104] ss:$8 sps:$4 sm:$0xff]   ;;  %v2579_v37 = vld [vmem:[%s3877_s1 + $0x100] ss:$8 sps:$4 sm:$0xff]   ;;  %v2584_v39 = vld [vmem:[%s3877_s1 + $0x114] ss:$8 sps:$4 sm:$0xff]  }
   0xd   :  { %v3104_v35 = vld [vmem:[%s3876_s0 + $0x8] sm:$0xff]  ;;  %v2582_v40 = vld [vmem:[%s3877_s1 + $0x110] ss:$8 sps:$4 sm:$0xff]   ;;  %v2590_v43 = vld [vmem:[%s3877_s1 + $0x134] ss:$8 sps:$4 sm:$0xff]  }
   0xe   :  { %v2208_v38 = vcombine.high %v3104_v35, %v3104_v35  ;;  %v2587_v41 = vld [vmem:[%s3877_s1 + $0x124] ss:$8 sps:$4 sm:$0xff]   ;;  %v2585_v42 = vld [vmem:[%s3877_s1 + $0x120] ss:$8 sps:$4 sm:$0xff]   ;;  %v2588_v44 = vld [vmem:[%s3877_s1 + $0x130] ss:$8 sps:$4 sm:$0xff]  }
   0xf   :  { %756 = vmatpush1.bf16.msra.mxu0 %v2540_v7  ;;  %v2593_v45 = vld [vmem:[%s3877_s1 + $0x144] ss:$8 sps:$4 sm:$0xff]   ;;  %v2591_v46 = vld [vmem:[%s3877_s1 + $0x140] ss:$8 sps:$4 sm:$0xff]   ;;  %v2596_v47 = vld [vmem:[%s3877_s1 + $0x154] ss:$8 sps:$4 sm:$0xff]  }
  0x10   :  { %757 = vmatprep.subr.bf16.mxu0 %v2541_v8  ;;  %v2594_v48 = vld [vmem:[%s3877_s1 + $0x150] ss:$8 sps:$4 sm:$0xff]   ;;  %v2599_v49 = vld [vmem:[%s3877_s1 + $0x164] ss:$8 sps:$4 sm:$0xff]   ;;  %v2597_v50 = vld [vmem:[%s3877_s1 + $0x160] ss:$8 sps:$4 sm:$0xff]  }
  0x11   :  { %v2602_v51 = vld [vmem:[%s3877_s1 + $0x174] ss:$8 sps:$4 sm:$0xff]   ;;  %v2600_v52 = vld [vmem:[%s3877_s1 + $0x170] ss:$8 sps:$4 sm:$0xff]   ;;  %v2605_v53 = vld [vmem:[%s3877_s1 + $0x184] ss:$8 sps:$4 sm:$0xff]  }
  0x12   :  { %v2603_v54 = vld [vmem:[%s3877_s1 + $0x180] ss:$8 sps:$4 sm:$0xff]   ;;  %v2608_v55 = vld [vmem:[%s3877_s1 + $0x194] ss:$8 sps:$4 sm:$0xff]   ;;  %v2606_v59 = vld [vmem:[%s3877_s1 + $0x190] ss:$8 sps:$4 sm:$0xff]  }
  0x13   :  { %758 = vmatpush1.bf16.msra.mxu0 %v2543_v9  ;;  %v2704_v56 = vld [vmem:[%s3879_s3 + $0x40] sm:$0xff]   ;;  %v2706_v58 = vld [vmem:[%s3879_s3 + $0x48] sm:$0xff]   ;;  %v2614_v63 = vld [vmem:[%s3877_s1 + $0x1b4] ss:$8 sps:$4 sm:$0xff]  }
  0x14   :  { %759 = vmatprep.subr.bf16.mxu0 %v2544_v10  ;;  %v2705_v57 = vld [vmem:[%s3879_s3] sm:$0xff]   ;;  %2469 = vmatprep.subr.bf16.mxu1 %v2704_v56  ;;  %v2707_v62 = vld [vmem:[%s3879_s3 + $0x8] sm:$0xff]   ;;  %v2708_v0 = vld [vmem:[%s3879_s3 + $0x50] sm:$0xff]  }
  0x15   :  { %v2611_v60 = vld [vmem:[%s3877_s1 + $0x1a4] ss:$8 sps:$4 sm:$0xff]   ;;  %v2609_v61 = vld [vmem:[%s3877_s1 + $0x1a0] ss:$8 sps:$4 sm:$0xff]   ;;  %2470 = vmatpush3.bf16.msra.mxu1 %v2705_v57  ;;  %v2709_v1 = vld [vmem:[%s3879_s3 + $0x10] sm:$0xff]  }
  0x16   :  { %2471 = vmatprep.subr.bf16.mxu1 %v2706_v58  ;;  %v2710_v2 = vld [vmem:[%s3879_s3 + $0x58] sm:$0xff]   ;;  %v2617_v4 = vld [vmem:[%s3877_s1 + $0x1c4] ss:$8 sps:$4 sm:$0xff]   ;;  %v2615_v7 = vld [vmem:[%s3877_s1 + $0x1c0] ss:$8 sps:$4 sm:$0xff]  }
  0x17   :  { %760 = vmatpush1.bf16.msra.mxu0 %v2546_v11  ;;  %v2612_v3 = vld [vmem:[%s3877_s1 + $0x1b0] ss:$8 sps:$4 sm:$0xff]   ;;  %v2712_v6 = vld [vmem:[%s3879_s3 + $0x60] sm:$0xff]   ;;  %v2620_v8 = vld [vmem:[%s3877_s1 + $0x1d4] ss:$8 sps:$4 sm:$0xff]  }
  0x18   :  { %761 = vmatprep.subr.bf16.mxu0 %v2547_v12  ;;  %v2711_v5 = vld [vmem:[%s3879_s3 + $0x18] sm:$0xff]   ;;  %v2713_v9 = vld [vmem:[%s3879_s3 + $0x20] sm:$0xff]   ;;  %v2714_v10 = vld [vmem:[%s3879_s3 + $0x68] sm:$0xff]  }
  0x19   :  { %2472 = vmatpush3.bf16.msra.mxu1 %v2707_v62  ;;  %v2618_v11 = vld [vmem:[%s3877_s1 + $0x1d0] ss:$8 sps:$4 sm:$0xff]   ;;  %v2623_v12 = vld [vmem:[%s3877_s1 + $0x1e4] ss:$8 sps:$4 sm:$0xff]   ;;  %v2621_v14 = vld [vmem:[%s3877_s1 + $0x1e0] ss:$8 sps:$4 sm:$0xff]  }
  0x1a   :  { %2473 = vmatprep.subr.bf16.mxu1 %v2708_v0  ;;  %v2715_v13 = vld [vmem:[%s3879_s3 + $0x28] sm:$0xff]  }
  0x1b   :  { %762 = vmatpush1.bf16.msra.mxu0 %v2549_v15  ;;  %v2626_v15 = vld [vmem:[%s3877_s1 + $0x1f4] ss:$8 sps:$4 sm:$0xff]  }
  0x1c   :  { %763 = vmatprep.subr.bf16.mxu0 %v2550_v16  ;;  %v2624_v16 = vld [vmem:[%s3877_s1 + $0x1f0] ss:$8 sps:$4 sm:$0xff]  }
  0x1d   :  { %2474 = vmatpush3.bf16.msra.mxu1 %v2709_v1 }
  0x1e   :  { %2475 = vmatprep.subr.bf16.mxu1 %v2710_v2 }
  0x1f   :  { %764 = vmatpush1.bf16.msra.mxu0 %v2552_v17  ;;  %v2631_v17 = vld [vmem:[%s3877_s1 + $0x204] ss:$8 sps:$4 sm:$0xff]  }
  0x20   :  { %765 = vmatprep.subr.bf16.mxu0 %v2553_v18  ;;  %v3243_v18 = vld [vmem:[%s3876_s0 + $0x10] sm:$0xff] }
  0x21   :  { %2476 = vmatpush3.bf16.msra.mxu1 %v2711_v5 }
  0x22   :  { %2477 = vmatprep.subr.bf16.mxu1 %v2712_v6 }
  0x23   :  { %766 = vmatpush1.bf16.msra.mxu0 %v2555_v19  ;;  %v2629_v19 = vld [vmem:[%s3877_s1 + $0x200] ss:$8 sps:$4 sm:$0xff]  }
  0x24   :  { %767 = vmatprep.subr.bf16.mxu0 %v2556_v20  ;;  %v2207_v20 = vcombine.low %v3104_v35, %v3104_v35 }
  0x25   :  { %2478 = vmatpush3.bf16.msra.mxu1 %v2713_v9 }
  0x26   :  { %2479 = vmatprep.subr.bf16.mxu1 %v2714_v10 }
  0x27   :  { %768 = vmatpush1.bf16.msra.mxu0 %v2558_v21  ;;  %v2634_v21 = vld [vmem:[%s3877_s1 + $0x214] ss:$8 sps:$4 sm:$0xff]  }
  0x28   :  { %769 = vmatprep.subr.bf16.mxu0 %v2559_v22  ;;  %v2210_v22 = vcombine.high %v3243_v18, %v3243_v18 }
  0x29   :  { %2480 = vmatpush3.bf16.msra.mxu1 %v2715_v13 }
  0x2b   :  { %770 = vmatpush1.bf16.msra.mxu0 %v2561_v23  ;;  %v2632_v23 = vld [vmem:[%s3877_s1 + $0x210] ss:$8 sps:$4 sm:$0xff]  }
  0x2c   :  { %771 = vmatprep.subr.bf16.mxu0 %v2562_v24  ;;  %v2637_v24 = vld [vmem:[%s3877_s1 + $0x224] ss:$8 sps:$4 sm:$0xff]  }
  0x2f   :  { %772 = vmatpush1.bf16.msra.mxu0 %v2564_v25  ;;  %v2635_v25 = vld [vmem:[%s3877_s1 + $0x220] ss:$8 sps:$4 sm:$0xff]  }
  0x30   :  { %773 = vmatprep.subr.bf16.mxu0 %v2565_v26  ;;  %v2640_v26 = vld [vmem:[%s3877_s1 + $0x234] ss:$8 sps:$4 sm:$0xff]  }
  0x33   :  { %774 = vmatpush1.bf16.msra.mxu0 %v2567_v27  ;;  %v2638_v27 = vld [vmem:[%s3877_s1 + $0x230] ss:$8 sps:$4 sm:$0xff]  }
  0x34   :  { %775 = vmatprep.subr.bf16.mxu0 %v2568_v28 }
  0x37   :  { %776 = vmatpush1.bf16.msra.mxu0 %v2570_v29 }
  0x38   :  { %777 = vmatprep.subr.bf16.mxu0 %v2571_v30 }
  0x3b   :  { %778 = vmatpush1.bf16.msra.mxu0 %v2573_v31 }
  0x3c   :  { %779 = vmatprep.subr.bf16.mxu0 %v2574_v32 }
  0x3f   :  { %780 = vmatpush1.bf16.msra.mxu0 %v2576_v33 }
  0x40   :  { %790 = vmatprep.subr.bf16.mxu0 %v2581_v34 }
  0x42   :  { %782 = vmatmul.mubr.bf16.vlgmr.msra.gmra.mrb[0].mxu0 %v2205_v36 }
  0x43   :  { %791 = vmatpush1.bf16.msra.mxu0 %v2579_v37  ;;  %822 = vmatprep.mubr.bf16.mxu0 %v2208_v38 }
  0x44   :  { %792 = vmatprep.subr.bf16.mxu0 %v2584_v39 }
  0x47   :  { %793 = vmatpush1.bf16.msra.mxu0 %v2582_v40 }
  0x48   :  { %794 = vmatprep.subr.bf16.mxu0 %v2587_v41 }
  0x4b   :  { %795 = vmatpush1.bf16.msra.mxu0 %v2585_v42 }
  0x4c   :  { %796 = vmatprep.subr.bf16.mxu0 %v2590_v43 }
  0x4f   :  { %797 = vmatpush1.bf16.msra.mxu0 %v2588_v44 }
  0x50   :  { %798 = vmatprep.subr.bf16.mxu0 %v2593_v45 }
  0x53   :  { %799 = vmatpush1.bf16.msra.mxu0 %v2591_v46 }
  0x54   :  { %800 = vmatprep.subr.bf16.mxu0 %v2596_v47 }
  0x57   :  { %801 = vmatpush1.bf16.msra.mxu0 %v2594_v48 }
  0x58   :  { %802 = vmatprep.subr.bf16.mxu0 %v2599_v49 }
  0x5b   :  { %803 = vmatpush1.bf16.msra.mxu0 %v2597_v50 }
  0x5c   :  { %804 = vmatprep.subr.bf16.mxu0 %v2602_v51 }
  0x5f   :  { %805 = vmatpush1.bf16.msra.mxu0 %v2600_v52 }
  0x60   :  { %806 = vmatprep.subr.bf16.mxu0 %v2605_v53 }
  0x63   :  { %807 = vmatpush1.bf16.msra.mxu0 %v2603_v54 }
  0x64   :  { %808 = vmatprep.subr.bf16.mxu0 %v2608_v55 }
  0x67   :  { %809 = vmatpush1.bf16.msra.mxu0 %v2606_v59 }
  0x68   :  { %810 = vmatprep.subr.bf16.mxu0 %v2611_v60 }
  0x6b   :  { %811 = vmatpush1.bf16.msra.mxu0 %v2609_v61 }
  0x6c   :  { %812 = vmatprep.subr.bf16.mxu0 %v2614_v63 }
  0x6f   :  { %813 = vmatpush1.bf16.msra.mxu0 %v2612_v3 }
  0x70   :  { %814 = vmatprep.subr.bf16.mxu0 %v2617_v4 }
  0x73   :  { %815 = vmatpush1.bf16.msra.mxu0 %v2615_v7 }
  0x74   :  { %816 = vmatprep.subr.bf16.mxu0 %v2620_v8 }
  0x77   :  { %817 = vmatpush1.bf16.msra.mxu0 %v2618_v11 }
  0x78   :  { %818 = vmatprep.subr.bf16.mxu0 %v2623_v12 }
  0x7b   :  { %819 = vmatpush1.bf16.msra.mxu0 %v2621_v14 }
  0x7c   :  { %820 = vmatprep.subr.bf16.mxu0 %v2626_v15 }
  0x7f   :  { %821 = vmatpush1.bf16.msra.mxu0 %v2624_v16 }
  0x80   :  { %831 = vmatprep.subr.bf16.mxu0 %v2631_v17 }
  0x82   :  { %823 = vmatmul.mubr.bf16.vlgmr.msra.gmra.mrb[0].mxu0 %v2207_v20 }
  0x83   :  { %832 = vmatpush1.bf16.msra.mxu0 %v2629_v19  ;;  %863 = vmatprep.mubr.bf16.mxu0 %v2210_v22 }
  0x84   :  { %833 = vmatprep.subr.bf16.mxu0 %v2634_v21 }
  0x87   :  { %834 = vmatpush1.bf16.msra.mxu0 %v2632_v23 }
  0x88   :  { %835 = vmatprep.subr.bf16.mxu0 %v2637_v24 }
  0x8b   :  { %836 = vmatpush1.bf16.msra.mxu0 %v2635_v25 }
  0x8c   :  { %16 = vsyncpa [#allocation3], 0  ;;  %837 = vmatprep.subr.bf16.mxu0 %v2640_v26  ;;  %v2643_v28 = vld [vmem:[%s3877_s1 + $0x244] ss:$8 sps:$4 sm:$0xff]   ;;  %v2641_v29 = vld [vmem:[%s3877_s1 + $0x240] ss:$8 sps:$4 sm:$0xff]   ;;  %v2209_v53 = vcombine.low %v3243_v18, %v3243_v18  ;;  %v154_v12 = vlaneseq }
  0x8d   :  { %v2646_v30 = vld [vmem:[%s3877_s1 + $0x254] ss:$8 sps:$4 sm:$0xff]   ;;  %v2644_v31 = vld [vmem:[%s3877_s1 + $0x250] ss:$8 sps:$4 sm:$0xff]   ;;  %v2649_v32 = vld [vmem:[%s3877_s1 + $0x264] ss:$8 sps:$4 sm:$0xff]  }
  0x8e   :  { %v2647_v33 = vld [vmem:[%s3877_s1 + $0x260] ss:$8 sps:$4 sm:$0xff]   ;;  %v2652_v34 = vld [vmem:[%s3877_s1 + $0x274] ss:$8 sps:$4 sm:$0xff]   ;;  %v2650_v35 = vld [vmem:[%s3877_s1 + $0x270] ss:$8 sps:$4 sm:$0xff]  }
  0x8f   :  { %838 = vmatpush1.bf16.msra.mxu0 %v2638_v27  ;;  %v2655_v36 = vld [vmem:[%s3877_s1 + $0x284] ss:$8 sps:$4 sm:$0xff]   ;;  %v2653_v37 = vld [vmem:[%s3877_s1 + $0x280] ss:$8 sps:$4 sm:$0xff]   ;;  %v2658_v38 = vld [vmem:[%s3877_s1 + $0x294] ss:$8 sps:$4 sm:$0xff]  }
  0x90   :  { %839 = vmatprep.subr.bf16.mxu0 %v2643_v28  ;;  %v2656_v39 = vld [vmem:[%s3877_s1 + $0x290] ss:$8 sps:$4 sm:$0xff]   ;;  %v2661_v40 = vld [vmem:[%s3877_s1 + $0x2a4] ss:$8 sps:$4 sm:$0xff]   ;;  %v2659_v41 = vld [vmem:[%s3877_s1 + $0x2a0] ss:$8 sps:$4 sm:$0xff]  }
  0x91   :  { %v2664_v42 = vld [vmem:[%s3877_s1 + $0x2b4] ss:$8 sps:$4 sm:$0xff]   ;;  %v2662_v43 = vld [vmem:[%s3877_s1 + $0x2b0] ss:$8 sps:$4 sm:$0xff]   ;;  %v2667_v44 = vld [vmem:[%s3877_s1 + $0x2c4] ss:$8 sps:$4 sm:$0xff]  }
  0x92   :  { %v2665_v45 = vld [vmem:[%s3877_s1 + $0x2c0] ss:$8 sps:$4 sm:$0xff]   ;;  %v2670_v46 = vld [vmem:[%s3877_s1 + $0x2d4] ss:$8 sps:$4 sm:$0xff]   ;;  %v2668_v47 = vld [vmem:[%s3877_s1 + $0x2d0] ss:$8 sps:$4 sm:$0xff]  }
  0x93   :  { %840 = vmatpush1.bf16.msra.mxu0 %v2641_v29  ;;  %v2673_v48 = vld [vmem:[%s3877_s1 + $0x2e4] ss:$8 sps:$4 sm:$0xff]   ;;  %v2671_v49 = vld [vmem:[%s3877_s1 + $0x2e0] ss:$8 sps:$4 sm:$0xff]   ;;  %v2676_v50 = vld [vmem:[%s3877_s1 + $0x2f4] ss:$8 sps:$4 sm:$0xff]  }
  0x94   :  { %841 = vmatprep.subr.bf16.mxu0 %v2646_v30  ;;  %v2674_v51 = vld [vmem:[%s3877_s1 + $0x2f0] ss:$8 sps:$4 sm:$0xff]   ;;  %v2681_v52 = vld [vmem:[%s3877_s1 + $0x304] ss:$8 sps:$4 sm:$0xff]   ;;  %v2679_v54 = vld [vmem:[%s3877_s1 + $0x300] ss:$8 sps:$4 sm:$0xff]  }
  0x95   :  { %v2684_v55 = vld [vmem:[%s3877_s1 + $0x314] ss:$8 sps:$4 sm:$0xff]   ;;  %v2682_v56 = vld [vmem:[%s3877_s1 + $0x310] ss:$8 sps:$4 sm:$0xff]   ;;  %v2942_v57 = vmov 0   ;;  %v3410_v13 = vshrl.u32 %v154_v12, 7 }
  0x96   :  { %v2687_v58 = vld [vmem:[%s3877_s1 + $0x324] ss:$8 sps:$4 sm:$0xff]   ;;  %v2685_v59 = vld [vmem:[%s3877_s1 + $0x320] ss:$8 sps:$4 sm:$0xff]   ;;  %v2690_v60 = vld [vmem:[%s3877_s1 + $0x334] ss:$8 sps:$4 sm:$0xff]  }
  0x97   :  { %842 = vmatpush1.bf16.msra.mxu0 %v2644_v31  ;;  %v2688_v61 = vld [vmem:[%s3877_s1 + $0x330] ss:$8 sps:$4 sm:$0xff]   ;;  %v2693_v62 = vld [vmem:[%s3877_s1 + $0x344] ss:$8 sps:$4 sm:$0xff]   ;;  %v2691_v63 = vld [vmem:[%s3877_s1 + $0x340] ss:$8 sps:$4 sm:$0xff]  }
  0x98   :  { %843 = vmatprep.subr.bf16.mxu0 %v2649_v32  ;;  %v2696_v0 = vld [vmem:[%s3877_s1 + $0x354] ss:$8 sps:$4 sm:$0xff]   ;;  %v2694_v1 = vld [vmem:[%s3877_s1 + $0x350] ss:$8 sps:$4 sm:$0xff]   ;;  %v2699_v2 = vld [vmem:[%s3877_s1 + $0x364] ss:$8 sps:$4 sm:$0xff]  }
  0x99   :  { %v2697_v3 = vld [vmem:[%s3877_s1 + $0x360] ss:$8 sps:$4 sm:$0xff]   ;;  %v2702_v4 = vld [vmem:[%s3877_s1 + $0x374] ss:$8 sps:$4 sm:$0xff]   ;;  %v2700_v5 = vld [vmem:[%s3877_s1 + $0x370] ss:$8 sps:$4 sm:$0xff]  }
  0x9a   :  { %v2703_v6 = vld [vmem:[%s3876_s0 + $0x18] ss:$0 sps:$4 sm:$0xff]   ;;  %v2716_v7 = vld [vmem:[%s3879_s3 + $0x70] sm:$0xff]   ;;  %v2722_v11 = vld [vmem:[%s3881_s5 + $0x4] ss:$8 sps:$4 sm:$0xff]   ;;  %v3413_v14 = vsub.s32 0, %v3410_v13 }
  0x9b   :  { %844 = vmatpush1.bf16.msra.mxu0 %v2647_v33  ;;  %v2717_v8 = vld [vmem:[%s3879_s3 + $0x30] sm:$0xff]   ;;  %2481 = vmatprep.subr.bf16.mxu1 %v2716_v7  ;;  %v2718_v9 = vld [vmem:[%s3879_s3 + $0x78] sm:$0xff]   ;;  %v152_v15 = vld [vmem:[%s3878_s2] sm:$0x3]  ;;  %v3419_v16 = vsub.s32 1, %v3410_v13 }
  0x9c   :  { %845 = vmatprep.subr.bf16.mxu0 %v2652_v34  ;;  %2482 = vmatpush3.bf16.msra.mxu1 %v2717_v8  ;;  %v2719_v10 = vld [vmem:[%s3879_s3 + $0x38] sm:$0xff]   ;;  %v157_v17 = vrot.slane %v152_v15, %v3413_v14  ;;  %v2720_v28 = vld [vmem:[%s3881_s5] ss:$8 sps:$4 sm:$0xff]   ;;  %v2728_v32 = vld [vmem:[%s3881_s5 + $0x24] ss:$8 sps:$4 sm:$0xff]  }
  0x9d   :  { %2483 = vmatprep.subr.bf16.mxu1 %v2718_v9  ;;  %v161_v18 = vrot.slane %v152_v15, %v3419_v16  ;;  %v2725_v30 = vld [vmem:[%s3881_s5 + $0x14] ss:$8 sps:$4 sm:$0xff]   ;;  %v2723_v31 = vld [vmem:[%s3881_s5 + $0x10] ss:$8 sps:$4 sm:$0xff]   ;;  %v2726_v33 = vld [vmem:[%s3881_s5 + $0x20] ss:$8 sps:$4 sm:$0xff]  }
  0x9e   :  { %v2731_v34 = vld [vmem:[%s3881_s5 + $0x34] ss:$8 sps:$4 sm:$0xff]   ;;  %v2755_v7 = vld [vmem:[%s3883_s7 + $0xac] ss:$28 sps:$4 sm:$0xff]   ;;  %v2758_v9 = vld [vmem:[%s3883_s7 + $0xe4] ss:$28 sps:$4 sm:$0xff]  }
  0x9f   :  { %846 = vmatpush1.bf16.msra.mxu0 %v2650_v35  ;;  %v2729_v35 = vld [vmem:[%s3881_s5 + $0x30] ss:$8 sps:$4 sm:$0xff]   ;;  %v2753_v8 = vld [vmem:[%s3883_s7 + $0xa8] ss:$28 sps:$4 sm:$0xff]  }
  0xa0   :  { %847 = vmatprep.subr.bf16.mxu0 %v2655_v36  ;;  %2484 = vmatpush3.bf16.msra.mxu1 %v2719_v10  ;;  %v2734_v36 = vld [vmem:[%s3881_s5 + $0x44] ss:$8 sps:$4 sm:$0xff]   ;;  %v2756_v10 = vld [vmem:[%s3883_s7 + $0xe0] ss:$28 sps:$4 sm:$0xff]   ;;  %v2759_v12 = vld [vmem:[%s3883_s7 + $0x118] ss:$28 sps:$4 sm:$0xff]  }
  0xa1   :  { %1203 = vmatprep.subr.bf16.mxu1 %v2722_v11  ;;  %v2761_v11 = vld [vmem:[%s3883_s7 + $0x11c] ss:$28 sps:$4 sm:$0xff]   ;;  %v2764_v15 = vld [vmem:[%s3883_s7 + $0x154] ss:$28 sps:$4 sm:$0xff]  }
  0xa3   :  { %848 = vmatpush1.bf16.msra.mxu0 %v2653_v37  ;;  %v2732_v37 = vld [vmem:[%s3881_s5 + $0x40] ss:$8 sps:$4 sm:$0xff]  }
  0xa4   :  { %849 = vmatprep.subr.bf16.mxu0 %v2658_v38  ;;  %v2737_v38 = vld [vmem:[%s3881_s5 + $0x54] ss:$8 sps:$4 sm:$0xff]  }
  0xa7   :  { %850 = vmatpush1.bf16.msra.mxu0 %v2656_v39  ;;  %v2735_v39 = vld [vmem:[%s3881_s5 + $0x50] ss:$8 sps:$4 sm:$0xff]  }
  0xa8   :  { %851 = vmatprep.subr.bf16.mxu0 %v2661_v40  ;;  %v2740_v40 = vld [vmem:[%s3881_s5 + $0x64] ss:$8 sps:$4 sm:$0xff]  }
  0xab   :  { %852 = vmatpush1.bf16.msra.mxu0 %v2659_v41  ;;  %v2738_v41 = vld [vmem:[%s3881_s5 + $0x60] ss:$8 sps:$4 sm:$0xff]  }
  0xac   :  { %853 = vmatprep.subr.bf16.mxu0 %v2664_v42  ;;  %v2743_v42 = vld [vmem:[%s3881_s5 + $0x74] ss:$8 sps:$4 sm:$0xff]  }
  0xaf   :  { %854 = vmatpush1.bf16.msra.mxu0 %v2662_v43  ;;  %v2741_v43 = vld [vmem:[%s3881_s5 + $0x70] ss:$8 sps:$4 sm:$0xff]  }
  0xb0   :  { %855 = vmatprep.subr.bf16.mxu0 %v2667_v44  ;;  %v2746_v44 = vld [vmem:[%s3883_s7 + $0x4] ss:$28 sps:$4 sm:$0xff]  }
  0xb3   :  { %856 = vmatpush1.bf16.msra.mxu0 %v2665_v45  ;;  %v2771_v45 = vld [vmem:[%s3883_s7 + $0x1d8] ss:$28 sps:$4 sm:$0xff]  }
  0xb4   :  { %857 = vmatprep.subr.bf16.mxu0 %v2670_v46  ;;  %v2772_v46 = vld [vmem:[%s3883_s7 + $0x18] ss:$28 sps:$4 sm:$0xff]  }
  0xb7   :  { %858 = vmatpush1.bf16.msra.mxu0 %v2668_v47  ;;  %v2776_v47 = vld [vmem:[%s3883_s7 + $0x210] ss:$28 sps:$4 sm:$0xff]  }
  0xb8   :  { %859 = vmatprep.subr.bf16.mxu0 %v2673_v48  ;;  %v2777_v48 = vld [vmem:[%s3883_s7 + $0x50] ss:$28 sps:$4 sm:$0xff]  }
  0xbb   :  { %860 = vmatpush1.bf16.msra.mxu0 %v2671_v49  ;;  %v2781_v49 = vld [vmem:[%s3883_s7 + $0x248] ss:$28 sps:$4 sm:$0xff]  }
  0xbc   :  { %861 = vmatprep.subr.bf16.mxu0 %v2676_v50  ;;  %v2782_v50 = vld [vmem:[%s3883_s7 + $0x88] ss:$28 sps:$4 sm:$0xff]  }
  0xbf   :  { %862 = vmatpush1.bf16.msra.mxu0 %v2674_v51  ;;  %v2786_v51 = vld [vmem:[%s3883_s7 + $0x280] ss:$28 sps:$4 sm:$0xff]  }
  0xc0   :  { %872 = vmatprep.subr.bf16.mxu0 %v2681_v52  ;;  %v2787_v52 = vld [vmem:[%s3883_s7 + $0xc0] ss:$28 sps:$4 sm:$0xff]  }
  0xc2   :  { %864 = vmatmul.mubr.bf16.vlgmr.msra.gmra.mrb[0].mxu0 %v2209_v53  ;;  %v2791_v53 = vld [vmem:[%s3883_s7 + $0x2b8] ss:$28 sps:$4 sm:$0xff]  }
  0xc3   :  { %873 = vmatpush1.bf16.msra.mxu0 %v2679_v54  ;;  %904 = vmatprep.mubr.bf16.mxu0 %v2942_v57  ;;  %v2792_v54 = vld [vmem:[%s3883_s7 + $0xf8] ss:$28 sps:$4 sm:$0xff]  }
  0xc4   :  { %874 = vmatprep.subr.bf16.mxu0 %v2684_v55  ;;  %v2796_v55 = vld [vmem:[%s3883_s7 + $0x2f0] ss:$28 sps:$4 sm:$0xff]  }
  0xc7   :  { %875 = vmatpush1.bf16.msra.mxu0 %v2682_v56  ;;  %v2797_v56 = vld [vmem:[%s3883_s7 + $0x130] ss:$28 sps:$4 sm:$0xff]  }
  0xc8   :  { %876 = vmatprep.subr.bf16.mxu0 %v2687_v58  ;;  %v2324_v58 = vld [vmem:[%s3880_s4] ss:$0 sm:$0xff] }
  0xcb   :  { %877 = vmatpush1.bf16.msra.mxu0 %v2685_v59 }
  0xcc   :  { %878 = vmatprep.subr.bf16.mxu0 %v2690_v60 }
  0xcf   :  { %879 = vmatpush1.bf16.msra.mxu0 %v2688_v61 }
  0xd0   :  { %880 = vmatprep.subr.bf16.mxu0 %v2693_v62 }
  0xd3   :  { %881 = vmatpush1.bf16.msra.mxu0 %v2691_v63 }
  0xd4   :  { %882 = vmatprep.subr.bf16.mxu0 %v2696_v0 }
  0xd7   :  { %883 = vmatpush1.bf16.msra.mxu0 %v2694_v1  ;;  %v2744_v1 = vld [vmem:[%s3883_s7] ss:$28 sps:$4 sm:$0xff]  }
  0xd8   :  { %884 = vmatprep.subr.bf16.mxu0 %v2699_v2 }
  0xdb   :  { %885 = vmatpush1.bf16.msra.mxu0 %v2697_v3  ;;  %v2749_v3 = vld [vmem:[%s3883_s7 + $0x3c] ss:$28 sps:$4 sm:$0xff]  }
  0xdc   :  { %886 = vmatprep.subr.bf16.mxu0 %v2702_v4  ;;  %v2747_v4 = vld [vmem:[%s3883_s7 + $0x38] ss:$28 sps:$4 sm:$0xff]  }
  0xdf   :  { %887 = vmatpush1.bf16.msra.mxu0 %v2700_v5  ;;  %v2752_v5 = vld [vmem:[%s3883_s7 + $0x74] ss:$28 sps:$4 sm:$0xff]  }
  0xe0   :  { %2491 = vmatprep.subr.bf16.mxu0 %v2771_v45 }
  0xe2   :  { %905 = vmatmul.mubr.bf16.vlgmr.msra.gmra.mrb[0].mxu0 %v2703_v6  ;;  %v2750_v6 = vld [vmem:[%s3883_s7 + $0x70] ss:$28 sps:$4 sm:$0xff]  }
  0xe3   :  { %2492 = vmatpush3.bf16.msra.mxu0 %v2772_v46 }
  0xe4   :  { %2493 = vmatprep.subr.bf16.mxu0 %v2776_v47 }
  0xe7   :  { %2494 = vmatpush3.bf16.msra.mxu0 %v2777_v48 }
  0xe8   :  { %2495 = vmatprep.subr.bf16.mxu0 %v2781_v49 }
  0xeb   :  { %2496 = vmatpush3.bf16.msra.mxu0 %v2782_v50 }
  0xec   :  { %2497 = vmatprep.subr.bf16.mxu0 %v2786_v51 }
  0xef   :  { %2498 = vmatpush3.bf16.msra.mxu0 %v2787_v52 }
  0xf0   :  { %2499 = vmatprep.subr.bf16.mxu0 %v2791_v53  ;;  %v2808_v53 = vld [vmem:[%s3883_s7 + $0x8] ss:$28 sps:$4 sm:$0xff]  }
  0xf3   :  { %2500 = vmatpush3.bf16.msra.mxu0 %v2792_v54 }
  0xf4   :  { %2501 = vmatprep.subr.bf16.mxu0 %v2796_v55  ;;  %v2813_v55 = vld [vmem:[%s3883_s7 + $0x44] ss:$28 sps:$4 sm:$0xff]  }
  0xf7   :  { %2502 = vmatpush3.bf16.msra.mxu0 %v2797_v56  ;;  %v2811_v56 = vld [vmem:[%s3883_s7 + $0x40] ss:$28 sps:$4 sm:$0xff]  }
 0x1b5   :  { %v906_v19 = vpop.f32.mrb[0].mxu0 }
 0x1b6   :  { %v2513_v20 = vadd.f32 %v906_v19, %v157_v17  ;;  %v908_v21 = vpop.f32.mrb[1].mxu0  ;;  %v2762_v17 = vld [vmem:[%s3883_s7 + $0x150] ss:$28 sps:$4 sm:$0xff]   ;;  %v2765_v19 = vld [vmem:[%s3883_s7 + $0x188] ss:$28 sps:$4 sm:$0xff]  }
 0x1b7   :  { %v2514_v22 = vadd.f32 %v908_v21, %v161_v18  ;;  %v910_v23 = vpop.f32.mrb[2].mxu0  ;;  %v2767_v18 = vld [vmem:[%s3883_s7 + $0x18c] ss:$28 sps:$4 sm:$0xff]   ;;  %v2768_v21 = vld [vmem:[%s3883_s7 + $0x1c0] ss:$28 sps:$4 sm:$0xff]  }
 0x1b8   :  { %v913_v24 = vmax.f32 %v2513_v20, 0.0  ;;  %v911_v25 = vpop.f32.mrb[3].mxu0  ;;  %v2770_v20 = vld [vmem:[%s3883_s7 + $0x1c4] ss:$28 sps:$4 sm:$0xff]   ;;  %v2773_v23 = vld [vmem:[%s3883_s7 + $0x1f8] ss:$28 sps:$4 sm:$0xff]  }
 0x1b9   :  { %v914_v26 = vmax.f32 %v2514_v22, 0.0  ;;  %v2775_v22 = vld [vmem:[%s3883_s7 + $0x1fc] ss:$28 sps:$4 sm:$0xff]   ;;  %v2778_v25 = vld [vmem:[%s3883_s7 + $0x230] ss:$28 sps:$4 sm:$0xff]  }
 0x1ba   :  { %v915_v29 = vpack.c.bf16 %v913_v24, %v913_v24  ;;  %v2780_v24 = vld [vmem:[%s3883_s7 + $0x234] ss:$28 sps:$4 sm:$0xff]  }
 0x1bb   :  { %v916_v27 = vpack.c.bf16 %v914_v26, %v914_v26  ;;  %v2785_v26 = vld [vmem:[%s3883_s7 + $0x26c] ss:$28 sps:$4 sm:$0xff]  }
 0x1bd   :  { %1084 = vmatprep.mubr.bf16.mxu1 %v916_v27  ;;  %v2783_v27 = vld [vmem:[%s3883_s7 + $0x268] ss:$28 sps:$4 sm:$0xff]  }
 0x1be   :  { %1085 = vmatmul.mubr.bf16.vlgmr.msra.gmra.mrb[0].mxu1 %v915_v29  ;;  %v2788_v29 = vld [vmem:[%s3883_s7 + $0x2a0] ss:$28 sps:$4 sm:$0xff]  }
 0x1bf   :  { %1204 = vmatpush1.bf16.msra.mxu1 %v2720_v28  ;;  %1235 = vmatprep.mubr.bf16.mxu1 %v2942_v57  ;;  %v2790_v28 = vld [vmem:[%s3883_s7 + $0x2a4] ss:$28 sps:$4 sm:$0xff]  }
 0x1c0   :  { %1205 = vmatprep.subr.bf16.mxu1 %v2725_v30  ;;  %v2795_v30 = vld [vmem:[%s3883_s7 + $0x2dc] ss:$28 sps:$4 sm:$0xff]  }
 0x1c3   :  { %1206 = vmatpush1.bf16.msra.mxu1 %v2723_v31  ;;  %v2793_v31 = vld [vmem:[%s3883_s7 + $0x2d8] ss:$28 sps:$4 sm:$0xff]  }
 0x1c4   :  { %1207 = vmatprep.subr.bf16.mxu1 %v2728_v32  ;;  %v2800_v32 = vld [vmem:[%s3883_s7 + $0x314] ss:$28 sps:$4 sm:$0xff]  }
 0x1c7   :  { %1208 = vmatpush1.bf16.msra.mxu1 %v2726_v33  ;;  %v2798_v33 = vld [vmem:[%s3883_s7 + $0x310] ss:$28 sps:$4 sm:$0xff]  }
 0x1c8   :  { %1209 = vmatprep.subr.bf16.mxu1 %v2731_v34  ;;  %v2801_v34 = vld [vmem:[%s3883_s7 + $0x328] ss:$28 sps:$4 sm:$0xff]  }
 0x1c9   :  { %2503 = vmatprep.subr.bf16.mxu0 %v2801_v34  ;;  %v2873_v34 = vld [vmem:[%s3883_s7 + $0x12c] ss:$28 sps:$4 sm:$0xff]  }
 0x1cb   :  { %1210 = vmatpush1.bf16.msra.mxu1 %v2729_v35  ;;  %v2802_v35 = vld [vmem:[%s3883_s7 + $0x168] ss:$28 sps:$4 sm:$0xff]  }
 0x1cc   :  { %1211 = vmatprep.subr.bf16.mxu1 %v2734_v36  ;;  %2504 = vmatpush3.bf16.msra.mxu0 %v2802_v35  ;;  %v2805_v36 = vld [vmem:[%s3883_s7 + $0x34c] ss:$28 sps:$4 sm:$0xff]  }
 0x1cd   :  { %v2871_v35 = vld [vmem:[%s3883_s7 + $0x128] ss:$28 sps:$4 sm:$0xff]  }
 0x1cf   :  { %1212 = vmatpush1.bf16.msra.mxu1 %v2732_v37  ;;  %v2803_v37 = vld [vmem:[%s3883_s7 + $0x348] ss:$28 sps:$4 sm:$0xff]  }
 0x1d0   :  { %1213 = vmatprep.subr.bf16.mxu1 %v2737_v38  ;;  %v2806_v38 = vld [vmem:[%s3883_s7 + $0x360] ss:$28 sps:$4 sm:$0xff]  }
 0x1d1   :  { %2505 = vmatprep.subr.bf16.mxu0 %v2806_v38  ;;  %v2879_v38 = vld [vmem:[%s3883_s7 + $0x19c] ss:$28 sps:$4 sm:$0xff]  }
 0x1d3   :  { %1214 = vmatpush1.bf16.msra.mxu1 %v2735_v39  ;;  %v2807_v39 = vld [vmem:[%s3883_s7 + $0x1a0] ss:$28 sps:$4 sm:$0xff]  }
 0x1d4   :  { %1215 = vmatprep.subr.bf16.mxu1 %v2740_v40  ;;  %2506 = vmatpush3.bf16.msra.mxu0 %v2807_v39  ;;  %v2810_v40 = vld [vmem:[%s3883_s7 + $0xc] ss:$28 sps:$4 sm:$0xff]   ;;  %v2877_v39 = vld [vmem:[%s3883_s7 + $0x198] ss:$28 sps:$4 sm:$0xff]  }
 0x1d7   :  { %1216 = vmatpush1.bf16.msra.mxu1 %v2738_v41  ;;  %v1111_v41 = vld [vmem:[%s3882_s6] sm:$0x3] }
 0x1d8   :  { %1217 = vmatprep.subr.bf16.mxu1 %v2743_v42  ;;  %v1116_v42 = vrot.slane %v1111_v41, %v3413_v14 }
 0x1db   :  { %1218 = vmatpush1.bf16.msra.mxu1 %v2741_v43  ;;  %v1120_v43 = vrot.slane %v1111_v41, %v3419_v16  ;;  %v2880_v41 = vld [vmem:[%s3883_s7 + $0x1d0] ss:$28 sps:$4 sm:$0xff]  }
 0x1dc   :  { %1989 = vmatprep.subr.bf16.mxu1 %v2746_v44 }
 0x291   :  { %v2485_v57 = vpop.f32.mrb[0].mxu1 }
 0x292   :  { %v2486_v59 = vpop.f32.mrb[1].mxu1 }
 0x293   :  { %v2487_v60 = vadd.f32 %v2486_v59, %v2485_v57  ;;  %v2488_v61 = vpop.f32.mrb[2].mxu1  ;;  %v2816_v57 = vld [vmem:[%s3883_s7 + $0x7c] ss:$28 sps:$4 sm:$0xff]   ;;  %v2819_v59 = vld [vmem:[%s3883_s7 + $0xb4] ss:$28 sps:$4 sm:$0xff]  }
 0x294   :  { %v2489_v62 = vpop.f32.mrb[3].mxu1  ;;  %v2822_v61 = vld [vmem:[%s3883_s7 + $0xec] ss:$28 sps:$4 sm:$0xff]  }
 0x295   :  { %v1087_v63 = vadd.f32 %v2487_v60, %v2324_v58  ;;  %v2814_v58 = vld [vmem:[%s3883_s7 + $0x78] ss:$28 sps:$4 sm:$0xff]   ;;  %v2817_v60 = vld [vmem:[%s3883_s7 + $0xb0] ss:$28 sps:$4 sm:$0xff]   ;;  %v2820_v62 = vld [vmem:[%s3883_s7 + $0xe8] ss:$28 sps:$4 sm:$0xff]  }
 0x297   :  { %v1092_v0 = vmax.f32 %v1087_v63, 0.0  ;;  %v2825_v63 = vld [vmem:[%s3883_s7 + $0x124] ss:$28 sps:$4 sm:$0xff]  }
 0x299   :  { %v1094_v2 = vpack.c.bf16 %v1092_v0, %v1092_v0  ;;  %1093 = vst [vmem:[#allocation2] sm:$0xff] %v1092_v0  ;;  %v2823_v0 = vld [vmem:[%s3883_s7 + $0x120] ss:$28 sps:$4 sm:$0xff]  }
 0x29b   :  { %1236 = vmatmul.mubr.bf16.vlgmr.msra.gmra.mrb[4].mxu1 %v1094_v2  ;;  %v2826_v2 = vld [vmem:[%s3883_s7 + $0x158] ss:$28 sps:$4 sm:$0xff]  }
 0x29c   :  { %1990 = vmatpush1.bf16.msra.mxu1 %v2744_v1  ;;  %v2828_v1 = vld [vmem:[%s3883_s7 + $0x15c] ss:$28 sps:$4 sm:$0xff]  }
 0x29d   :  { %1991 = vmatprep.subr.bf16.mxu1 %v2749_v3  ;;  %v2831_v3 = vld [vmem:[%s3883_s7 + $0x194] ss:$28 sps:$4 sm:$0xff]  }
 0x2a0   :  { %1992 = vmatpush1.bf16.msra.mxu1 %v2747_v4  ;;  %v2829_v4 = vld [vmem:[%s3883_s7 + $0x190] ss:$28 sps:$4 sm:$0xff]  }
 0x2a1   :  { %1993 = vmatprep.subr.bf16.mxu1 %v2752_v5  ;;  %v2834_v5 = vld [vmem:[%s3883_s7 + $0x1cc] ss:$28 sps:$4 sm:$0xff]  }
 0x2a4   :  { %1994 = vmatpush1.bf16.msra.mxu1 %v2750_v6  ;;  %v2832_v6 = vld [vmem:[%s3883_s7 + $0x1c8] ss:$28 sps:$4 sm:$0xff]  }
 0x2a5   :  { %1995 = vmatprep.subr.bf16.mxu1 %v2755_v7  ;;  %v2837_v7 = vld [vmem:[%s3883_s7 + $0x204] ss:$28 sps:$4 sm:$0xff]  }
 0x2a8   :  { %1996 = vmatpush1.bf16.msra.mxu1 %v2753_v8  ;;  %v2835_v8 = vld [vmem:[%s3883_s7 + $0x200] ss:$28 sps:$4 sm:$0xff]  }
 0x2a9   :  { %1997 = vmatprep.subr.bf16.mxu1 %v2758_v9  ;;  %v2840_v9 = vld [vmem:[%s3883_s7 + $0x23c] ss:$28 sps:$4 sm:$0xff]  }
 0x2ac   :  { %1998 = vmatpush1.bf16.msra.mxu1 %v2756_v10  ;;  %v2838_v10 = vld [vmem:[%s3883_s7 + $0x238] ss:$28 sps:$4 sm:$0xff]  }
 0x2ad   :  { %1999 = vmatprep.subr.bf16.mxu1 %v2761_v11  ;;  %v2843_v11 = vld [vmem:[%s3883_s7 + $0x274] ss:$28 sps:$4 sm:$0xff]  }
 0x2b0   :  { %2000 = vmatpush1.bf16.msra.mxu1 %v2759_v12  ;;  %v2841_v12 = vld [vmem:[%s3883_s7 + $0x270] ss:$28 sps:$4 sm:$0xff]  }
 0x2b1   :  { %2001 = vmatprep.subr.bf16.mxu1 %v2764_v15  ;;  %v2846_v15 = vld [vmem:[%s3883_s7 + $0x2ac] ss:$28 sps:$4 sm:$0xff]  }
 0x2b4   :  { %2002 = vmatpush1.bf16.msra.mxu1 %v2762_v17  ;;  %v2844_v17 = vld [vmem:[%s3883_s7 + $0x2a8] ss:$28 sps:$4 sm:$0xff]  }
 0x2b5   :  { %2003 = vmatprep.subr.bf16.mxu1 %v2767_v18  ;;  %v2849_v18 = vld [vmem:[%s3883_s7 + $0x2e4] ss:$28 sps:$4 sm:$0xff]  }
 0x2b8   :  { %2004 = vmatpush1.bf16.msra.mxu1 %v2765_v19  ;;  %v2847_v19 = vld [vmem:[%s3883_s7 + $0x2e0] ss:$28 sps:$4 sm:$0xff]  }
 0x2b9   :  { %2005 = vmatprep.subr.bf16.mxu1 %v2770_v20  ;;  %v2852_v20 = vld [vmem:[%s3883_s7 + $0x31c] ss:$28 sps:$4 sm:$0xff]  }
 0x2bc   :  { %2006 = vmatpush1.bf16.msra.mxu1 %v2768_v21  ;;  %v2850_v21 = vld [vmem:[%s3883_s7 + $0x318] ss:$28 sps:$4 sm:$0xff]  }
 0x2bd   :  { %2007 = vmatprep.subr.bf16.mxu1 %v2775_v22  ;;  %v2855_v22 = vld [vmem:[%s3883_s7 + $0x354] ss:$28 sps:$4 sm:$0xff]  }
 0x2c0   :  { %2008 = vmatpush1.bf16.msra.mxu1 %v2773_v23  ;;  %v2853_v23 = vld [vmem:[%s3883_s7 + $0x350] ss:$28 sps:$4 sm:$0xff]  }
 0x2c1   :  { %2009 = vmatprep.subr.bf16.mxu1 %v2780_v24  ;;  %v2858_v24 = vld [vmem:[%s3883_s7 + $0x14] ss:$28 sps:$4 sm:$0xff]  }
 0x2c4   :  { %2010 = vmatpush1.bf16.msra.mxu1 %v2778_v25  ;;  %v2856_v25 = vld [vmem:[%s3883_s7 + $0x10] ss:$28 sps:$4 sm:$0xff]  }
 0x2c5   :  { %2011 = vmatprep.subr.bf16.mxu1 %v2785_v26  ;;  %v2861_v26 = vld [vmem:[%s3883_s7 + $0x4c] ss:$28 sps:$4 sm:$0xff]  }
 0x2c8   :  { %2012 = vmatpush1.bf16.msra.mxu1 %v2783_v27  ;;  %v2859_v27 = vld [vmem:[%s3883_s7 + $0x48] ss:$28 sps:$4 sm:$0xff]  }
 0x2c9   :  { %2013 = vmatprep.subr.bf16.mxu1 %v2790_v28  ;;  %v2864_v28 = vld [vmem:[%s3883_s7 + $0x84] ss:$28 sps:$4 sm:$0xff]  }
 0x2cc   :  { %2014 = vmatpush1.bf16.msra.mxu1 %v2788_v29  ;;  %v2862_v29 = vld [vmem:[%s3883_s7 + $0x80] ss:$28 sps:$4 sm:$0xff]  }
 0x2cd   :  { %2015 = vmatprep.subr.bf16.mxu1 %v2795_v30  ;;  %v2867_v30 = vld [vmem:[%s3883_s7 + $0xbc] ss:$28 sps:$4 sm:$0xff]  }
 0x2d0   :  { %2016 = vmatpush1.bf16.msra.mxu1 %v2793_v31  ;;  %v2865_v31 = vld [vmem:[%s3883_s7 + $0xb8] ss:$28 sps:$4 sm:$0xff]  }
 0x2d1   :  { %2017 = vmatprep.subr.bf16.mxu1 %v2800_v32  ;;  %v2870_v32 = vld [vmem:[%s3883_s7 + $0xf4] ss:$28 sps:$4 sm:$0xff]  }
 0x2d4   :  { %2018 = vmatpush1.bf16.msra.mxu1 %v2798_v33  ;;  %v2868_v33 = vld [vmem:[%s3883_s7 + $0xf0] ss:$28 sps:$4 sm:$0xff]  }
 0x2d5   :  { %2019 = vmatprep.subr.bf16.mxu1 %v2805_v36  ;;  %v2876_v36 = vld [vmem:[%s3883_s7 + $0x164] ss:$28 sps:$4 sm:$0xff]  }
 0x2d8   :  { %2020 = vmatpush1.bf16.msra.mxu1 %v2803_v37  ;;  %v2874_v37 = vld [vmem:[%s3883_s7 + $0x160] ss:$28 sps:$4 sm:$0xff]  }
 0x2d9   :  { %2030 = vmatprep.subr.bf16.mxu1 %v2810_v40  ;;  %v2882_v40 = vld [vmem:[%s3883_s7 + $0x1d4] ss:$28 sps:$4 sm:$0xff]  }
 0x36e   :  { %v1237_v44 = vpop.f32.mrb[4].mxu1 }
 0x36f   :  { %v1238_v45 = vadd.f32 %v1237_v44, %v1116_v42  ;;  %v1239_v46 = vpop.f32.mrb[5].mxu1  ;;  %v2885_v42 = vld [vmem:[%s3883_s7 + $0x20c] ss:$28 sps:$4 sm:$0xff]   ;;  %v2888_v44 = vld [vmem:[%s3883_s7 + $0x244] ss:$28 sps:$4 sm:$0xff]  }
 0x370   :  { %v1240_v47 = vadd.f32 %v1239_v46, %v1120_v43  ;;  %v1241_v48 = vpop.f32.mrb[6].mxu1  ;;  %v2883_v43 = vld [vmem:[%s3883_s7 + $0x208] ss:$28 sps:$4 sm:$0xff]   ;;  %v2891_v46 = vld [vmem:[%s3883_s7 + $0x27c] ss:$28 sps:$4 sm:$0xff]  }
 0x371   :  { %v1244_v49 = vmax.f32 %v1238_v45, 0.0  ;;  %v1242_v50 = vpop.f32.mrb[7].mxu1  ;;  %v2886_v45 = vld [vmem:[%s3883_s7 + $0x240] ss:$28 sps:$4 sm:$0xff]   ;;  %v2894_v48 = vld [vmem:[%s3883_s7 + $0x2b4] ss:$28 sps:$4 sm:$0xff]  }
 0x372   :  { %v1245_v51 = vmax.f32 %v1240_v47, 0.0  ;;  %v2889_v47 = vld [vmem:[%s3883_s7 + $0x278] ss:$28 sps:$4 sm:$0xff]   ;;  %v2897_v50 = vld [vmem:[%s3883_s7 + $0x2ec] ss:$28 sps:$4 sm:$0xff]  }
 0x373   :  { %v3628_v54 = vpack.c.bf16 %v1244_v49, %v1244_v49  ;;  %v2892_v49 = vld [vmem:[%s3883_s7 + $0x2b0] ss:$28 sps:$4 sm:$0xff]  }
 0x374   :  { %v3623_v52 = vpack.c.bf16 %v1245_v51, %v1245_v51  ;;  %v2895_v51 = vld [vmem:[%s3883_s7 + $0x2e8] ss:$28 sps:$4 sm:$0xff]  }
 0x376   :  { %2021 = vmatprep.mubr.bf16.mxu1 %v3623_v52  ;;  %2144 = vmatprep.mubr.bf16.mxu0 %v3623_v52 }
 0x377   :  { %2022 = vmatmul.mubr.bf16.vlgmr.msra.gmra.mrb[8].mxu1 %v3628_v54  ;;  %2145 = vmatmul.mubr.bf16.vlgmr.msra.gmra.mrb[4].mxu0 %v3628_v54 }
 0x378   :  { %2031 = vmatpush1.bf16.msra.mxu1 %v2808_v53  ;;  %2062 = vmatprep.mubr.bf16.mxu1 %v3623_v52  ;;  %v2898_v53 = vld [vmem:[%s3883_s7 + $0x320] ss:$28 sps:$4 sm:$0xff]  }
 0x379   :  { %2032 = vmatprep.subr.bf16.mxu1 %v2813_v55  ;;  %v2903_v55 = vld [vmem:[%s3883_s7 + $0x35c] ss:$28 sps:$4 sm:$0xff]  }
 0x37c   :  { %2033 = vmatpush1.bf16.msra.mxu1 %v2811_v56  ;;  %v2901_v56 = vld [vmem:[%s3883_s7 + $0x358] ss:$28 sps:$4 sm:$0xff]  }
 0x37d   :  { %2034 = vmatprep.subr.bf16.mxu1 %v2816_v57  ;;  %v3827_v57 = vld [vmem:[%s3884_s8] sm:$0xff] }
 0x380   :  { %2035 = vmatpush1.bf16.msra.mxu1 %v2814_v58  ;;  %v1404_v58 = vsub.s32 6, %v3410_v13 }
 0x381   :  { %2036 = vmatprep.subr.bf16.mxu1 %v2819_v59  ;;  %v1381_v59 = vrot.slane %v3827_v57, %v3413_v14 }
 0x384   :  { %2037 = vmatpush1.bf16.msra.mxu1 %v2817_v60  ;;  %v1385_v60 = vrot.slane %v3827_v57, %v3419_v16 }
 0x385   :  { %2038 = vmatprep.subr.bf16.mxu1 %v2822_v61 }
 0x388   :  { %2039 = vmatpush1.bf16.msra.mxu1 %v2820_v62 }
 0x389   :  { %2040 = vmatprep.subr.bf16.mxu1 %v2825_v63  ;;  %v1405_v63 = vrot.slane %v3827_v57, %v1404_v58 }
 0x38c   :  { %2041 = vmatpush1.bf16.msra.mxu1 %v2823_v0 }
 0x38d   :  { %2042 = vmatprep.subr.bf16.mxu1 %v2828_v1 }
 0x390   :  { %2043 = vmatpush1.bf16.msra.mxu1 %v2826_v2 }
 0x391   :  { %2044 = vmatprep.subr.bf16.mxu1 %v2831_v3 }
 0x394   :  { %2045 = vmatpush1.bf16.msra.mxu1 %v2829_v4 }
 0x395   :  { %2046 = vmatprep.subr.bf16.mxu1 %v2834_v5 }
 0x398   :  { %2047 = vmatpush1.bf16.msra.mxu1 %v2832_v6 }
 0x399   :  { %2048 = vmatprep.subr.bf16.mxu1 %v2837_v7 }
 0x39c   :  { %2049 = vmatpush1.bf16.msra.mxu1 %v2835_v8 }
 0x39d   :  { %2050 = vmatprep.subr.bf16.mxu1 %v2840_v9 }
 0x3a0   :  { %2051 = vmatpush1.bf16.msra.mxu1 %v2838_v10 }
 0x3a1   :  { %2052 = vmatprep.subr.bf16.mxu1 %v2843_v11 }
 0x3a4   :  { %2053 = vmatpush1.bf16.msra.mxu1 %v2841_v12 }
 0x3a5   :  { %2054 = vmatprep.subr.bf16.mxu1 %v2846_v15 }
 0x3a8   :  { %2055 = vmatpush1.bf16.msra.mxu1 %v2844_v17 }
 0x3a9   :  { %2056 = vmatprep.subr.bf16.mxu1 %v2849_v18 }
 0x3ac   :  { %2057 = vmatpush1.bf16.msra.mxu1 %v2847_v19 }
 0x3ad   :  { %2058 = vmatprep.subr.bf16.mxu1 %v2852_v20 }
 0x3b0   :  { %2059 = vmatpush1.bf16.msra.mxu1 %v2850_v21 }
 0x3b1   :  { %2060 = vmatprep.subr.bf16.mxu1 %v2855_v22 }
 0x3b4   :  { %2061 = vmatpush1.bf16.msra.mxu1 %v2853_v23 }
 0x3b5   :  { %2071 = vmatprep.subr.bf16.mxu1 %v2858_v24 }
 0x3b7   :  { %2063 = vmatmul.mubr.bf16.vlgmr.msra.gmra.mrb[12].mxu1 %v3628_v54 }
 0x3b8   :  { %2072 = vmatpush1.bf16.msra.mxu1 %v2856_v25  ;;  %2103 = vmatprep.mubr.bf16.mxu1 %v3623_v52  ;;  %v2900_v52 = vld [vmem:[%s3883_s7 + $0x324] ss:$28 sps:$4 sm:$0xff]   ;;  %s2943_s7 = smov [#allocation2]  }
 0x3b9   :  { %2073 = vmatprep.subr.bf16.mxu1 %v2861_v26  ;;  %s2193_s8 = sshll.u32 %s2943_s7, 4  ;;  %s2194_s8 = int_to_ptr.vmem [resolvable:$true] %s2193_s8 }
 0x3ba   :  { %s2918_s2 = scalar_lea.vmem %s2194_s8, 128  ;;  %p2923_p1 = scmp.lt.s32.totalorder %s2194_s8, %s2194_s8 }
 0x3bb   :  { %p2919_p0 = scmp.ne.s32.totalorder %s2194_s8, %s2918_s2  ;;  %p2924_p2 = scmp.lt.s32.totalorder %s2918_s2, %s2918_s2 }
 0x3bc   :  { %2074 = vmatpush1.bf16.msra.mxu1 %v2859_v27 }
 0x3bd   :  { %2075 = vmatprep.subr.bf16.mxu1 %v2864_v28  ;;  %p2925_p3 = por %p2924_p2, %p2923_p1 }
 0x3bf   :  { %p2926_p4 = pnand %p2925_p3, %p2919_p0 }
 0x3c0   :  { %2076 = vmatpush1.bf16.msra.mxu1 %v2862_v29 }
 0x3c1   :  { %2077 = vmatprep.subr.bf16.mxu1 %v2867_v30 }
 0x3c4   :  { %2078 = vmatpush1.bf16.msra.mxu1 %v2865_v31 }
 0x3c5   :  { %2079 = vmatprep.subr.bf16.mxu1 %v2870_v32 }
 0x3c8   :  { %2080 = vmatpush1.bf16.msra.mxu1 %v2868_v33 }
 0x3c9   :  { %2081 = vmatprep.subr.bf16.mxu1 %v2873_v34 }
 0x3cc   :  { %2082 = vmatpush1.bf16.msra.mxu1 %v2871_v35 }
 0x3cd   :  { %2083 = vmatprep.subr.bf16.mxu1 %v2876_v36 }
 0x3d0   :  { %2084 = vmatpush1.bf16.msra.mxu1 %v2874_v37 }
 0x3d1   :  { %2085 = vmatprep.subr.bf16.mxu1 %v2879_v38 }
 0x3d4   :  { %2086 = vmatpush1.bf16.msra.mxu1 %v2877_v39 }
 0x3d5   :  { %2087 = vmatprep.subr.bf16.mxu1 %v2882_v40 }
 0x3d8   :  { %2088 = vmatpush1.bf16.msra.mxu1 %v2880_v41 }
 0x3d9   :  { %2089 = vmatprep.subr.bf16.mxu1 %v2885_v42 }
 0x3dc   :  { %2090 = vmatpush1.bf16.msra.mxu1 %v2883_v43 }
 0x3dd   :  { %2091 = vmatprep.subr.bf16.mxu1 %v2888_v44 }
 0x3e0   :  { %2092 = vmatpush1.bf16.msra.mxu1 %v2886_v45 }
 0x3e1   :  { %2093 = vmatprep.subr.bf16.mxu1 %v2891_v46 }
 0x3e4   :  { %2094 = vmatpush1.bf16.msra.mxu1 %v2889_v47 }
 0x3e5   :  { %2095 = vmatprep.subr.bf16.mxu1 %v2894_v48 }
 0x3e8   :  { %2096 = vmatpush1.bf16.msra.mxu1 %v2892_v49 }
 0x3e9   :  { %2097 = vmatprep.subr.bf16.mxu1 %v2897_v50 }
 0x3ec   :  { %2098 = vmatpush1.bf16.msra.mxu1 %v2895_v51 }
 0x3ed   :  { %2099 = vmatprep.subr.bf16.mxu1 %v2900_v52 }
 0x3f0   :  { %2100 = vmatpush1.bf16.msra.mxu1 %v2898_v53 }
 0x3f1   :  { %2101 = vmatprep.subr.bf16.mxu1 %v2903_v55 }
 0x3f4   :  { %2102 = vmatpush1.bf16.msra.mxu1 %v2901_v56 }
 0x3f7   :  { %2104 = vmatmul.mubr.bf16.vlgmr.msra.gmra.mrb[16].mxu1 %v3628_v54 }
 0x44a   :  { %v2023_v61 = vpop.f32.mrb[8].mxu1  ;;  %v2507_v62 = vpop.f32.mrb[4].mxu0 }
 0x44b   :  { %v2024_v0 = vadd.f32 %v2023_v61, %v1381_v59  ;;  %v2025_v1 = vpop.f32.mrb[9].mxu1  ;;  %v2508_v54 = vpop.f32.mrb[5].mxu0 }
 0x44c   :  { %v2026_v2 = vadd.f32 %v2025_v1, %v1385_v60  ;;  %v2509_v3 = vadd.f32 %v2508_v54, %v2507_v62  ;;  %v2027_v4 = vpop.f32.mrb[10].mxu1  ;;  %v2510_v5 = vpop.f32.mrb[6].mxu0 }
 0x44d   :  { %v2152_v6 = vmul.f32 0.5, %v2024_v0  ;;  %v2028_v7 = vpop.f32.mrb[11].mxu1  ;;  %v2511_v8 = vpop.f32.mrb[7].mxu0 }
 0x44e   :  { %v2153_v9 = vmul.f32 0.5, %v2026_v2  ;;  %v2147_v10 = vadd.f32 %v2509_v3, %v1405_v63 }
 0x44f   :  { %2904 = vtanh.f32 %v2152_v6 }
 0x450   :  { %2906 = vtanh.f32 %v2153_v9  ;;  %v2158_v14 = vmul.f32 0.5, %v2147_v10 }
 0x452   :  { %2908 = vtanh.f32 %v2158_v14 }
 0x459   :  { %v2905_v16 = vpop.eup %2904 }
 0x45a   :  { %v2907_v11 = vpop.eup %2906  ;;  %v2166_v12 = vadd.f32 1.0, %v2905_v16 }
 0x45b   :  { %v2167_v15 = vadd.f32 1.0, %v2907_v11 }
 0x45c   :  { %v2909_v17 = vpop.eup %2908  ;;  %v2173_v18 = vmul.f32 0.5, %v2166_v12 }
 0x45d   :  { %v2174_v19 = vmul.f32 0.5, %v2167_v15  ;;  %v2172_v20 = vadd.f32 1.0, %v2909_v17 }
 0x45e   :  { %2180 = vst [vmem:[%s3886_s10] sm:$0xff] %v2173_v18 }
 0x45f   :  { %2181 = vst [vmem:[%s3886_s10 + $0x8] sm:$0xff] %v2174_v19  ;;  %v2179_v21 = vmul.f32 0.5, %v2172_v20 }
 0x460   :  { %2929 = shalt.err (!%p2926_p4)
}
 0x461   :  { %s2930_s22 = scalar_lea.hbm %s3885_s9, 128 }
 0x462   :  { %p2931_p5 = scmp.ne.s32.totalorder %s3885_s9, %s2930_s22  ;;  %p2934_p6 = scmp.lt.u32.totalorder %s2930_s22, %s3885_s9 }
 0x464   :  { %p2936_p7 = pnand %p2934_p6, %p2931_p5 }
 0x466   :  { %2939 = shalt.err (!%p2936_p7)
}
 0x467   :  { %2196 = dma.vmem_to_hbm [thread:$0]  %s2194_s8, 128, %s3885_s9, [#allocation3]   ;;  %2186 = vst [vmem:[%s3886_s10 + $0x30] sm:$0xff] %v2179_v21  ;;  %v1388_v22 = vsub.s32 2, %v3410_v13  ;;  %v1392_v23 = vsub.s32 3, %v3410_v13  ;;  %v1396_v40 = vsub.s32 4, %v3410_v13 }
 0x468   :  { %v1400_v41 = vsub.s32 5, %v3410_v13 }
 0x469   :  { %v1389_v24 = vrot.slane %v3827_v57, %v1388_v22  ;;  %v1393_v25 = vrot.slane %v3827_v57, %v1392_v23  ;;  %v1397_v42 = vrot.slane %v3827_v57, %v1396_v40 }
 0x46a   :  { %v1401_v43 = vrot.slane %v3827_v57, %v1400_v41 }
 0x48a   :  { %v2064_v26 = vpop.f32.mrb[12].mxu1 }
 0x48b   :  { %v2065_v27 = vadd.f32 %v2064_v26, %v1389_v24  ;;  %v2066_v28 = vpop.f32.mrb[13].mxu1 }
 0x48c   :  { %v2067_v29 = vadd.f32 %v2066_v28, %v1393_v25  ;;  %v2068_v30 = vpop.f32.mrb[14].mxu1 }
 0x48d   :  { %v2154_v31 = vmul.f32 0.5, %v2065_v27  ;;  %v2069_v32 = vpop.f32.mrb[15].mxu1 }
 0x48e   :  { %v2155_v33 = vmul.f32 0.5, %v2067_v29 }
 0x48f   :  { %2910 = vtanh.f32 %v2154_v31 }
 0x490   :  { %2912 = vtanh.f32 %v2155_v33 }
 0x499   :  { %v2911_v34 = vpop.eup %2910 }
 0x49a   :  { %v2913_v35 = vpop.eup %2912  ;;  %v2168_v36 = vadd.f32 1.0, %v2911_v34 }
 0x49b   :  { %v2169_v37 = vadd.f32 1.0, %v2913_v35 }
 0x49c   :  { %v2175_v38 = vmul.f32 0.5, %v2168_v36 }
 0x49d   :  { %v2176_v39 = vmul.f32 0.5, %v2169_v37 }
 0x49e   :  { %2182 = vst [vmem:[%s3886_s10 + $0x10] sm:$0xff] %v2175_v38 }
 0x49f   :  { %2183 = vst [vmem:[%s3886_s10 + $0x18] sm:$0xff] %v2176_v39 }
 0x4ca   :  { %v2105_v44 = vpop.f32.mrb[16].mxu1 }
 0x4cb   :  { %v2106_v45 = vadd.f32 %v2105_v44, %v1397_v42  ;;  %v2107_v46 = vpop.f32.mrb[17].mxu1 }
 0x4cc   :  { %v2108_v47 = vadd.f32 %v2107_v46, %v1401_v43  ;;  %v2109_v48 = vpop.f32.mrb[18].mxu1 }
 0x4cd   :  { %v2156_v49 = vmul.f32 0.5, %v2106_v45  ;;  %v2110_v50 = vpop.f32.mrb[19].mxu1 }
 0x4ce   :  { %v2157_v51 = vmul.f32 0.5, %v2108_v47 }
 0x4cf   :  { %2914 = vtanh.f32 %v2156_v49 }
 0x4d0   :  { %2916 = vtanh.f32 %v2157_v51 }
 0x4d9   :  { %v2915_v52 = vpop.eup %2914 }
 0x4da   :  { %v2917_v53 = vpop.eup %2916  ;;  %v2170_v55 = vadd.f32 1.0, %v2915_v52 }
 0x4db   :  { %v2171_v56 = vadd.f32 1.0, %v2917_v53 }
 0x4dc   :  { %v2177_v58 = vmul.f32 0.5, %v2170_v55 }
 0x4dd   :  { %v2178_v13 = vmul.f32 0.5, %v2171_v56 }
 0x4de   :  { %2184 = vst [vmem:[%s3886_s10 + $0x20] sm:$0xff] %v2177_v58 }
 0x4df   :  { %2185 = vst [vmem:[%s3886_s10 + $0x28] sm:$0xff] %v2178_v13 }
 0x4e0   :  { %2940 = dma.done.wait [#allocation3], 128  }
 0x4e1   :  { %2941 = vsyncadd [#allocation3], 4294967168 }
 0x4e2   :  { %2204 = vsyncpa [#allocation3], 1 }

</bundles_post_ra>
